<compile_context>
chip_gen: v7x
topology: tpu7x:2x2x1
jax: 0.10.0
libtpu: 0.0.40
codegen_flags: <defaults>
</compile_context>

<pallas_src>
import jax
import jax.numpy as jnp
from jax import lax
from jax.experimental import pallas as pl
from jax.experimental.pallas import tpu as pltpu


# ----------------------------------------------------------------------------------
# Fused kernel factory (trace-time constants closed over)
# ----------------------------------------------------------------------------------
def _make_criterion_kernel(*, q_real, q_pad, eos_coef, inv_num_boxes):
    has_pad = q_pad > q_real

    def kernel(logits_ref, tclass_ref, matched_ref, tlen_ref,
               lu_ref, poly_x_ref, poly_z_ref, txs_ref, tys_ref, tzs_ref,
               flags_ref, out_ref, acc_ref):
        c1 = logits_ref.shape[0]                      # num_classes + 1
        no_obj = c1 - 1
        b, tq = tclass_ref.shape
        q = pl.program_id(0)
        nq = pl.num_programs(0)

        @pl.when(q == 0)
        def _init():
            acc_ref[...] = jnp.zeros_like(acc_ref)

        # ---------------- per-tile classification stats (lanes = queries) ---------
        tclass = tclass_ref[...]                      # (B, TQ) int32
        matched = matched_ref[...]                    # (B, TQ) f32

        # two-pass streaming log-softmax over the small unrolled class axis:
        # pass 1: running max; pass 2: sum-exp, target logit, argmax.
        m = logits_ref[0].astype(jnp.float32)
        for c in range(1, c1):
            m = jnp.maximum(m, logits_ref[c].astype(jnp.float32))
        sum_exp = jnp.zeros_like(m)
        picked = jnp.zeros_like(m)
        arg = jnp.full(m.shape, c1, jnp.int32)
        for c in range(c1):
            xc = logits_ref[c].astype(jnp.float32)
            sum_exp = sum_exp + jnp.exp(xc - m)
            picked = jnp.where(tclass == c, xc, picked)
            # first maximal index; documented tie-break divergence vs torch.argmax
            arg = jnp.minimum(arg, jnp.where(xc == m, c, c1))
        nll = m + jnp.log(sum_exp) - picked           # (B, TQ)

        # empty_weight is all-ones except the no-object class -> one select
        wt = jnp.where(tclass == no_obj, eos_coef, 1.0).astype(jnp.float32)
        correct = matched * (arg == tclass).astype(jnp.float32)
        non_empty = (arg != no_obj).astype(jnp.float32)
        if has_pad:   # mask out padded query columns (trace-time branch)
            pos = q * tq + lax.broadcasted_iota(jnp.int32, (b, tq), 1)
            qvalid = (pos < q_real).astype(jnp.float32)
            wt = wt * qvalid
            non_empty = non_empty * qvalid

        # fused lane reductions: one (5, B, TQ) -> (5, B, 1) pass, accumulated
        stacked = jnp.stack([wt * nll, wt, correct, matched, non_empty], axis=0)
        acc_ref[...] += jnp.sum(stacked, axis=2, keepdims=True)

        # ---------------- finalize + box losses on the last grid step -------------
        @pl.when(q == nq - 1)
        def _finalize():
            tot = acc_ref[...]                        # (5, B, 1)
            ce_num = jnp.sum(tot[0])
            ce_den = jnp.sum(tot[1])
            n_correct = jnp.sum(tot[2])
            n_matched = jnp.sum(tot[3])
            card_pred = tot[4]                        # (B, 1)

            out_ref[0] = ce_num / ce_den
            # guard: torch's accuracy() would divide by zero with no matches
            out_ref[1] = 100.0 - 100.0 * n_correct / jnp.maximum(n_matched, 1.0)
            out_ref[2] = jnp.sum(jnp.abs(card_pred - tlen_ref[...])) * (1.0 / b)

            # boxes: lanes = matched targets N, sublanes = sequence points S
            flags = flags_ref[...]                                      # (S, N)
            valid = (flags > 0).astype(jnp.float32)
            row_valid = jnp.sum(valid, axis=0, keepdims=True)           # (1, N)
            # torch: w = sqrt(total/row); w /= w.max()  ==  sqrt(min_row/row).
            # If any matched target has zero valid points torch collapses every
            # finite weight to 0; sqrt(min_row)=0 reproduces that exactly (and no
            # NaN/inf ever enters the masked sums).
            min_row = jnp.min(row_valid)
            w_norm = jnp.sqrt(min_row) * lax.rsqrt(jnp.maximum(row_valid, 1.0))
            wv = w_norm * valid                                         # (S, N)

            y = tys_ref[...]                                            # (S, N)
            px = poly_x_ref[...]                                        # (4, S, N)
            pz = poly_z_ref[...]
            pred_x = ((px[0] * y + px[1]) * y + px[2]) * y + px[3]
            pred_z = ((pz[0] * y + pz[1]) * y + pz[2]) * y + pz[3]
            # |a*w - b*w| == |a-b| * w   (w >= 0)
            xs_sum = jnp.sum(jnp.abs(pred_x - txs_ref[...]) * wv)
            zs_sum = jnp.sum(jnp.abs(pred_z - tzs_ref[...]) * wv)

            lu = lu_ref[...]                                            # (4, N)
            lo_sum = jnp.sum(jnp.abs(lu[0:1] - lu[2:3]))
            up_sum = jnp.sum(jnp.abs(lu[1:2] - lu[3:4]))

            out_ref[3] = lo_sum * inv_num_boxes
            out_ref[4] = up_sum * inv_num_boxes
            out_ref[5] = xs_sum * inv_num_boxes
            out_ref[6] = zs_sum * inv_num_boxes
            out_ref[7] = jnp.float32(0.0)

    return kernel


def _pick_tile_q(q, b, c1, logits_itemsize):
    """Generation-aware query-tile size (lane axis), multiple of 128."""
    try:
        vmem_cap = int(getattr(pltpu.get_tpu_info(), "vmem_capacity_bytes", 64 << 20))
    except Exception:
        vmem_cap = 64 << 20          # v7x per-TensorCore; conservative for v5e/v6e
    budget = max(vmem_cap // 4, 2 << 20)
    # double-buffered bytes per query column: logits + target class (i32) + matched (f32)
    per_q = 2 * b * (c1 * logits_itemsize + 8)
    tile_q = max(128, min(4096, (budget // per_q) // 128 * 128))
    if q <= tile_q:
        return q, 1, q, vmem_cap     # single whole block: no padding, no grid overhead
    n_tiles = -(-q // tile_q)
    return tile_q, n_tiles, n_tiles * tile_q, vmem_cap


# ----------------------------------------------------------------------------------
# SetCriterion (JAX/Pallas)
# ----------------------------------------------------------------------------------
class SetCriterion:
    def __init__(self, num_classes, matcher, weight_dict, eos_coef, losses, seq_len,
                 cast_logits_to_bf16=True):
        self.num_classes = num_classes
        self.matcher = matcher
        self.weight_dict = weight_dict
        self.eos_coef = float(eos_coef)
        self.losses = losses
        self.seq_len = seq_len
        self.cast_logits_to_bf16 = cast_logits_to_bf16
        # kept for API parity (the kernel folds it into a single eos_coef select)
        self.empty_weight = jnp.ones((num_classes + 1,), jnp.float32).at[-1].set(eos_coef)

    # plain-JAX glue mirroring _get_src_permutation_idx
    @staticmethod
    def _src_permutation_idx(indices):
        batch_idx = jnp.concatenate(
            [jnp.full_like(src, i) for i, (src, _) in enumerate(indices)])
        src_idx = jnp.concatenate([src for src, _ in indices])
        return batch_idx, src_idx

    def forward(self, outputs, targets, targets_flag):
        indices = self.matcher(outputs, targets, targets_flag)
        # TODO(synk): torch.distributed.all_reduce(num_boxes) / world-size not modeled.
        num_boxes = float(max(sum(int(t.shape[0]) for t in targets), 1))

        pred_logits = outputs['pred_logits']
        pred_boxes = outputs['pred_boxes']
        B, Q, C1 = pred_logits.shape

        batch_idx, src_idx = self._src_permutation_idx(indices)

        # ---------------- classification targets --------------------------------
        labels_o = jnp.concatenate(
            [targets[i][:, 0][t].astype(jnp.int32) for i, (_, t) in enumerate(indices)])
        target_classes = jnp.full((B, Q), self.num_classes, jnp.int32)
        target_classes = target_classes.at[batch_idx, src_idx].set(labels_o)
        matched = jnp.zeros((B, Q), jnp.float32).at[batch_idx, src_idx].set(1.0)
        tlen = jnp.array([[t.shape[0]] for t in targets], jnp.float32)        # (B, 1)

        # lane-dense layout: classes -> leading axis, (batch, query) -> (sublane, lane)
        logits_t = jnp.transpose(pred_logits, (2, 0, 1))                      # (C1, B, Q)
        if self.cast_logits_to_bf16 and logits_t.dtype == jnp.float32:
            logits_t = logits_t.astype(jnp.bfloat16)   # halves HBM traffic; compute stays f32

        tile_q, n_tiles, q_pad, vmem_cap = _pick_tile_q(
            Q, B, C1, jnp.dtype(logits_t.dtype).itemsize)
        if q_pad > Q:
            pad = q_pad - Q
            logits_t = jnp.pad(logits_t, ((0, 0), (0, 0), (0, pad)))
            target_classes = jnp.pad(target_classes, ((0, 0), (0, pad)),
                                     constant_values=self.num_classes)
            matched = jnp.pad(matched, ((0, 0), (0, pad)))

        # ---------------- boxes: (feature, N) tensors, N (matched) on lanes -----
        # TODO(synk): pre-pack `targets` into one padded (B, NT_max, dim) tensor so
        # this per-batch gather/concat glue collapses to a couple of XLA ops.
        S = (targets[0].shape[1] - 5) // 8
        self.seq_len = S
        src_box = pred_boxes[batch_idx, src_idx]                              # (N, 12)
        space = jnp.concatenate(
            [targets[i][:, 3 + 2 * S:5 + 5 * S][t] for i, (_, t) in enumerate(indices)],
            axis=0)                                                           # (N, 2+3S)
        flags_m = jnp.concatenate(
            [targets_flag[i][t] for i, (_, t) in enumerate(indices)], axis=0)  # (N, S)
        N = src_box.shape[0]
        assert N > 0  # TODO(synk): zero matched targets not supported by the box path

        lu = jnp.stack([src_box[:, 2], src_box[:, 3], space[:, 0], space[:, 1]],
                       axis=0)                                                # (4, N)
        poly_x = jnp.broadcast_to(src_box[:, 4:8].T[:, None, :], (4, S, N))
        poly_z = jnp.broadcast_to(src_box[:, 8:12].T[:, None, :], (4, S, N))
        txs = space[:, 2:2 + S].T                                             # (S, N)
        tys = space[:, 2 + S:2 + 2 * S].T
        tzs = space[:, 2 + 2 * S:2 + 3 * S].T
        flags_t = flags_m.T.astype(jnp.float32)                               # (S, N)

        kernel = _make_criterion_kernel(
            q_real=Q, q_pad=q_pad, eos_coef=self.eos_coef,
            inv_num_boxes=1.0 / num_boxes)

        # scoped-VMEM limit sized from actual footprint (v5e default is only 16 MiB)
        resident = sum(int(x.size) * jnp.dtype(x.dtype).itemsize
                       for x in (tlen, lu, poly_x, poly_z, txs, tys, tzs, flags_t))
        tiled = 2 * B * tile_q * (C1 * jnp.dtype(logits_t.dtype).itemsize + 8)
        vmem_limit = int(2 * (2 * resident + tiled) + (2 << 20))
        vmem_limit = min(max(vmem_limit, 8 << 20), vmem_cap)

        out = pl.pallas_call(
            kernel,
            out_shape=jax.ShapeDtypeStruct((8,), jnp.float32),
            grid=(n_tiles,),
            in_specs=[
                pl.BlockSpec((C1, B, tile_q), lambda q: (0, 0, q)),
                pl.BlockSpec((B, tile_q), lambda q: (0, q)),
                pl.BlockSpec((B, tile_q), lambda q: (0, q)),
                pl.BlockSpec((B, 1), lambda q: (0, 0)),
                pl.BlockSpec((4, N), lambda q: (0, 0)),
                pl.BlockSpec((4, S, N), lambda q: (0, 0, 0)),
                pl.BlockSpec((4, S, N), lambda q: (0, 0, 0)),
                pl.BlockSpec((S, N), lambda q: (0, 0)),
                pl.BlockSpec((S, N), lambda q: (0, 0)),
                pl.BlockSpec((S, N), lambda q: (0, 0)),
                pl.BlockSpec((S, N), lambda q: (0, 0)),
            ],
            out_specs=pl.BlockSpec((8,), lambda q: (0,),
                                   memory_space=pltpu.MemorySpace.SMEM),
            scratch_shapes=[pltpu.VMEM((5, B, 1), jnp.float32)],
            compiler_params=pltpu.CompilerParams(
                dimension_semantics=("arbitrary",),
                vmem_limit_bytes=vmem_limit),
        )(logits_t, target_classes, matched, tlen,
          lu, poly_x, poly_z, txs, tys, tzs, flags_t)

        losses = {
            'loss_ce': out[0],
            'class_error': out[1],
            'cardinality_error': out[2],
            'loss_gflatlowers': out[3],
            'loss_gflatuppers': out[4],
            'loss_gflatpolys': out[5],
            'loss_gflatzsys': out[6],
        }
        return losses, indices


# ----------------------------------------------------------------------------------
# Deterministic matcher stand-in (the real Hungarian matcher is an external module)
# ----------------------------------------------------------------------------------
def deterministic_matcher(outputs, targets, targets_flag):
    # TODO(synk): Hungarian assignment (linear_sum_assignment) is host-side
    # combinatorial optimization with no clean Pallas equivalent; SetCriterion
    # receives the matcher externally, so use a fixed deterministic assignment.
    Q = outputs['pred_logits'].shape[1]
    indices = []
    for b, t in enumerate(targets):
        nt = t.shape[0]
        src = (jnp.arange(nt, dtype=jnp.int32) * 2 + b) % Q
        tgt = jnp.arange(nt, dtype=jnp.int32)[::-1]
        indices.append((src, tgt))
    return indices


# ----------------------------------------------------------------------------------
if __name__ == "__main__":
    key = jax.random.PRNGKey(0)
    B, Q, num_classes, S, NT = 2, 8, 4, 8, 3
    C1 = num_classes + 1
    tgt_dim = 5 + 8 * S                       # loss_boxes derives seq_len = (dim-5)//8

    k1, k2, k3, k4, k5 = jax.random.split(key, 5)
    pred_logits = jax.random.normal(k1, (B, Q, C1), jnp.float32)
    pred_boxes = jax.random.normal(k2, (B, Q, 12), jnp.float32)

    targets, targets_flag = [], []
    for b in range(B):
        t = jax.random.normal(jax.random.fold_in(k3, b), (NT, tgt_dim), jnp.float32)
        labels = jax.random.randint(jax.random.fold_in(k4, b), (NT,), 0, num_classes)
        t = t.at[:, 0].set(labels.astype(jnp.float32))
        targets.append(t)
        f = (jax.random.uniform(jax.random.fold_in(k5, b), (NT, S)) > 0.3)
        f = f.astype(jnp.float32).at[:, 0].set(1.0)   # at least one valid point per row
        targets_flag.append(f)

    criterion = SetCriterion(
        num_classes=num_classes,
        matcher=deterministic_matcher,
        weight_dict={'loss_ce': 1.0, 'loss_gflatpolys': 5.0},
        eos_coef=0.1,
        losses=['labels', 'cardinality', 'boxes'],
        seq_len=S,
    )

    outputs = {'pred_logits': pred_logits, 'pred_boxes': pred_boxes}
    losses, indices = criterion.forward(outputs, targets, targets_flag)
    losses = {k: jax.block_until_ready(v) for k, v in losses.items()}

    for k, v in losses.items():
        assert bool(jnp.isfinite(v)), f"non-finite loss {k}"

    print("KERNEL_OK")
</pallas_src>

<mosaic_0001>
module attributes {stable_mosaic.version = 11 : i64} {
  func.func @kernel(%arg0: i32, %arg1: memref<5x2x8xbf16, #tpu.memory_space<vmem>>, %arg2: memref<2x8xi32, #tpu.memory_space<vmem>>, %arg3: memref<2x8xf32, #tpu.memory_space<vmem>>, %arg4: memref<2x1xf32, #tpu.memory_space<vmem>>, %arg5: memref<4x6xf32, #tpu.memory_space<vmem>>, %arg6: memref<4x8x6xf32, #tpu.memory_space<vmem>>, %arg7: memref<4x8x6xf32, #tpu.memory_space<vmem>>, %arg8: memref<8x6xf32, #tpu.memory_space<vmem>>, %arg9: memref<8x6xf32, #tpu.memory_space<vmem>>, %arg10: memref<8x6xf32, #tpu.memory_space<vmem>>, %arg11: memref<8x6xf32, #tpu.memory_space<vmem>>, %arg12: memref<8xf32, #tpu.memory_space<smem>>, %arg13: memref<5x2x1xf32, #tpu.memory_space<vmem>>) attributes {dimension_semantics = [#tpu.dimension_semantics<arbitrary>], iteration_bounds = array<i64: 1>, scalar_prefetch = 0 : i64, scratch_operands = 1 : i64, tpu.core_type = #tpu.core_type<tc>, window_params = [{transform_indices = @transform_0, window_bounds = array<i64: 5, 2, 8>}, {transform_indices = @transform_1, window_bounds = array<i64: 2, 8>}, {transform_indices = @transform_2, window_bounds = array<i64: 2, 8>}, {pipeline_mode = #tpu.pipeline_mode<synchronous>, transform_indices = @transform_3, window_bounds = array<i64: 2, 1>}, {pipeline_mode = #tpu.pipeline_mode<synchronous>, transform_indices = @transform_4, window_bounds = array<i64: 4, 6>}, {pipeline_mode = #tpu.pipeline_mode<synchronous>, transform_indices = @transform_5, window_bounds = array<i64: 4, 8, 6>}, {pipeline_mode = #tpu.pipeline_mode<synchronous>, transform_indices = @transform_6, window_bounds = array<i64: 4, 8, 6>}, {pipeline_mode = #tpu.pipeline_mode<synchronous>, transform_indices = @transform_7, window_bounds = array<i64: 8, 6>}, {pipeline_mode = #tpu.pipeline_mode<synchronous>, transform_indices = @transform_8, window_bounds = array<i64: 8, 6>}, {pipeline_mode = #tpu.pipeline_mode<synchronous>, transform_indices = @transform_9, window_bounds = array<i64: 8, 6>}, {pipeline_mode = #tpu.pipeline_mode<synchronous>, transform_indices = @transform_10, window_bounds = array<i64: 8, 6>}, {transform_indices = @transform_11, window_bounds = array<i64: 8>}]} {
    %c0_i32 = arith.constant 0 : i32
    %0 = arith.cmpi eq, %arg0, %c0_i32 : i32
    %1 = arith.extui %0 : i1 to i32
    %c0_i32_0 = arith.constant 0 : i32
    %2 = arith.cmpi ne, %1, %c0_i32_0 : i32
    scf.if %2 {
      %cst_55 = arith.constant 0.000000e+00 : f32
      %128 = vector.broadcast %cst_55 : f32 to vector<5x2x1xf32>
      %c0_56 = arith.constant 0 : index
      %c0_57 = arith.constant 0 : index
      %c0_58 = arith.constant 0 : index
      %129 = vector.load %arg13[%c0_56, %c0_57, %c0_58] : memref<5x2x1xf32, #tpu.memory_space<vmem>>, vector<5x2x1xf32>
      tpu.vector_store %arg13[%c0_56, %c0_57, %c0_58], %128 {strides = array<i32>} : memref<5x2x1xf32, #tpu.memory_space<vmem>>, vector<5x2x1xf32>,
    } else {
    }
    %c0 = arith.constant 0 : index
    %c0_1 = arith.constant 0 : index
    %3 = vector.load %arg2[%c0, %c0_1] : memref<2x8xi32, #tpu.memory_space<vmem>>, vector<2x8xi32>
    %c0_2 = arith.constant 0 : index
    %c0_3 = arith.constant 0 : index
    %4 = vector.load %arg3[%c0_2, %c0_3] : memref<2x8xf32, #tpu.memory_space<vmem>>, vector<2x8xf32>
    %c0_4 = arith.constant 0 : index
    %c0_5 = arith.constant 0 : index
    %c0_6 = arith.constant 0 : index
    %5 = vector.load %arg1[%c0_4, %c0_5, %c0_6] : memref<5x2x8xbf16, #tpu.memory_space<vmem>>, vector<1x2x8xbf16>
    %6 = vector.shape_cast %5 : vector<1x2x8xbf16> to vector<2x8xbf16>
    %7 = arith.extf %6 : vector<2x8xbf16> to vector<2x8xf32>
    %c1 = arith.constant 1 : index
    %c0_7 = arith.constant 0 : index
    %c0_8 = arith.constant 0 : index
    %8 = vector.load %arg1[%c1, %c0_7, %c0_8] : memref<5x2x8xbf16, #tpu.memory_space<vmem>>, vector<1x2x8xbf16>
    %9 = vector.shape_cast %8 : vector<1x2x8xbf16> to vector<2x8xbf16>
    %10 = arith.extf %9 : vector<2x8xbf16> to vector<2x8xf32>
    %11 = arith.maximumf %7, %10 : vector<2x8xf32>
    %c2 = arith.constant 2 : index
    %c0_9 = arith.constant 0 : index
    %c0_10 = arith.constant 0 : index
    %12 = vector.load %arg1[%c2, %c0_9, %c0_10] : memref<5x2x8xbf16, #tpu.memory_space<vmem>>, vector<1x2x8xbf16>
    %13 = vector.shape_cast %12 : vector<1x2x8xbf16> to vector<2x8xbf16>
    %14 = arith.extf %13 : vector<2x8xbf16> to vector<2x8xf32>
    %15 = arith.maximumf %11, %14 : vector<2x8xf32>
    %c3 = arith.constant 3 : index
    %c0_11 = arith.constant 0 : index
    %c0_12 = arith.constant 0 : index
    %16 = vector.load %arg1[%c3, %c0_11, %c0_12] : memref<5x2x8xbf16, #tpu.memory_space<vmem>>, vector<1x2x8xbf16>
    %17 = vector.shape_cast %16 : vector<1x2x8xbf16> to vector<2x8xbf16>
    %18 = arith.extf %17 : vector<2x8xbf16> to vector<2x8xf32>
    %19 = arith.maximumf %15, %18 : vector<2x8xf32>
    %c4 = arith.constant 4 : index
    %c0_13 = arith.constant 0 : index
    %c0_14 = arith.constant 0 : index
    %20 = vector.load %arg1[%c4, %c0_13, %c0_14] : memref<5x2x8xbf16, #tpu.memory_space<vmem>>, vector<1x2x8xbf16>
    %21 = vector.shape_cast %20 : vector<1x2x8xbf16> to vector<2x8xbf16>
    %22 = arith.extf %21 : vector<2x8xbf16> to vector<2x8xf32>
    %23 = arith.maximumf %19, %22 : vector<2x8xf32>
    %cst = arith.constant 0.000000e+00 : f32
    %24 = vector.broadcast %cst : f32 to vector<2x8xf32>
    %cst_15 = arith.constant 0.000000e+00 : f32
    %25 = vector.broadcast %cst_15 : f32 to vector<2x8xf32>
    %c5_i32 = arith.constant 5 : i32
    %26 = vector.broadcast %c5_i32 : i32 to vector<2x8xi32>
    %c0_16 = arith.constant 0 : index
    %c0_17 = arith.constant 0 : index
    %c0_18 = arith.constant 0 : index
    %27 = vector.load %arg1[%c0_16, %c0_17, %c0_18] : memref<5x2x8xbf16, #tpu.memory_space<vmem>>, vector<1x2x8xbf16>
    %28 = vector.shape_cast %27 : vector<1x2x8xbf16> to vector<2x8xbf16>
    %29 = arith.extf %28 : vector<2x8xbf16> to vector<2x8xf32>
    %30 = arith.subf %29, %23 : vector<2x8xf32>
    %31 = math.exp %30 : vector<2x8xf32>
    %32 = arith.addf %24, %31 : vector<2x8xf32>
    %c0_i32_19 = arith.constant 0 : i32
    %33 = vector.broadcast %c0_i32_19 : i32 to vector<2x8xi32>
    %34 = arith.cmpi eq, %3, %33 : vector<2x8xi32>
    %35 = arith.select %34, %29, %25 : vector<2x8xi1>, vector<2x8xf32>
    %36 = arith.cmpf oeq, %29, %23 : vector<2x8xf32>
    %c0_i32_20 = arith.constant 0 : i32
    %c5_i32_21 = arith.constant 5 : i32
    %37 = vector.broadcast %c0_i32_20 : i32 to vector<2x8xi32>
    %38 = vector.broadcast %c5_i32_21 : i32 to vector<2x8xi32>
    %39 = arith.select %36, %37, %38 : vector<2x8xi1>, vector<2x8xi32>
    %40 = arith.minsi %26, %39 : vector<2x8xi32>
    %c1_22 = arith.constant 1 : index
    %c0_23 = arith.constant 0 : index
    %c0_24 = arith.constant 0 : index
    %41 = vector.load %arg1[%c1_22, %c0_23, %c0_24] : memref<5x2x8xbf16, #tpu.memory_space<vmem>>, vector<1x2x8xbf16>
    %42 = vector.shape_cast %41 : vector<1x2x8xbf16> to vector<2x8xbf16>
    %43 = arith.extf %42 : vector<2x8xbf16> to vector<2x8xf32>
    %44 = arith.subf %43, %23 : vector<2x8xf32>
    %45 = math.exp %44 : vector<2x8xf32>
    %46 = arith.addf %32, %45 : vector<2x8xf32>
    %c1_i32 = arith.constant 1 : i32
    %47 = vector.broadcast %c1_i32 : i32 to vector<2x8xi32>
    %48 = arith.cmpi eq, %3, %47 : vector<2x8xi32>
    %49 = arith.select %48, %43, %35 : vector<2x8xi1>, vector<2x8xf32>
    %50 = arith.cmpf oeq, %43, %23 : vector<2x8xf32>
    %c1_i32_25 = arith.constant 1 : i32
    %c5_i32_26 = arith.constant 5 : i32
    %51 = vector.broadcast %c1_i32_25 : i32 to vector<2x8xi32>
    %52 = vector.broadcast %c5_i32_26 : i32 to vector<2x8xi32>
    %53 = arith.select %50, %51, %52 : vector<2x8xi1>, vector<2x8xi32>
    %54 = arith.minsi %40, %53 : vector<2x8xi32>
    %c2_27 = arith.constant 2 : index
    %c0_28 = arith.constant 0 : index
    %c0_29 = arith.constant 0 : index
    %55 = vector.load %arg1[%c2_27, %c0_28, %c0_29] : memref<5x2x8xbf16, #tpu.memory_space<vmem>>, vector<1x2x8xbf16>
    %56 = vector.shape_cast %55 : vector<1x2x8xbf16> to vector<2x8xbf16>
    %57 = arith.extf %56 : vector<2x8xbf16> to vector<2x8xf32>
    %58 = arith.subf %57, %23 : vector<2x8xf32>
    %59 = math.exp %58 : vector<2x8xf32>
    %60 = arith.addf %46, %59 : vector<2x8xf32>
    %c2_i32 = arith.constant 2 : i32
    %61 = vector.broadcast %c2_i32 : i32 to vector<2x8xi32>
    %62 = arith.cmpi eq, %3, %61 : vector<2x8xi32>
    %63 = arith.select %62, %57, %49 : vector<2x8xi1>, vector<2x8xf32>
    %64 = arith.cmpf oeq, %57, %23 : vector<2x8xf32>
    %c2_i32_30 = arith.constant 2 : i32
    %c5_i32_31 = arith.constant 5 : i32
    %65 = vector.broadcast %c2_i32_30 : i32 to vector<2x8xi32>
    %66 = vector.broadcast %c5_i32_31 : i32 to vector<2x8xi32>
    %67 = arith.select %64, %65, %66 : vector<2x8xi1>, vector<2x8xi32>
    %68 = arith.minsi %54, %67 : vector<2x8xi32>
    %c3_32 = arith.constant 3 : index
    %c0_33 = arith.constant 0 : index
    %c0_34 = arith.constant 0 : index
    %69 = vector.load %arg1[%c3_32, %c0_33, %c0_34] : memref<5x2x8xbf16, #tpu.memory_space<vmem>>, vector<1x2x8xbf16>
    %70 = vector.shape_cast %69 : vector<1x2x8xbf16> to vector<2x8xbf16>
    %71 = arith.extf %70 : vector<2x8xbf16> to vector<2x8xf32>
    %72 = arith.subf %71, %23 : vector<2x8xf32>
    %73 = math.exp %72 : vector<2x8xf32>
    %74 = arith.addf %60, %73 : vector<2x8xf32>
    %c3_i32 = arith.constant 3 : i32
    %75 = vector.broadcast %c3_i32 : i32 to vector<2x8xi32>
    %76 = arith.cmpi eq, %3, %75 : vector<2x8xi32>
    %77 = arith.select %76, %71, %63 : vector<2x8xi1>, vector<2x8xf32>
    %78 = arith.cmpf oeq, %71, %23 : vector<2x8xf32>
    %c3_i32_35 = arith.constant 3 : i32
    %c5_i32_36 = arith.constant 5 : i32
    %79 = vector.broadcast %c3_i32_35 : i32 to vector<2x8xi32>
    %80 = vector.broadcast %c5_i32_36 : i32 to vector<2x8xi32>
    %81 = arith.select %78, %79, %80 : vector<2x8xi1>, vector<2x8xi32>
    %82 = arith.minsi %68, %81 : vector<2x8xi32>
    %c4_37 = arith.constant 4 : index
    %c0_38 = arith.constant 0 : index
    %c0_39 = arith.constant 0 : index
    %83 = vector.load %arg1[%c4_37, %c0_38, %c0_39] : memref<5x2x8xbf16, #tpu.memory_space<vmem>>, vector<1x2x8xbf16>
    %84 = vector.shape_cast %83 : vector<1x2x8xbf16> to vector<2x8xbf16>
    %85 = arith.extf %84 : vector<2x8xbf16> to vector<2x8xf32>
    %86 = arith.subf %85, %23 : vector<2x8xf32>
    %87 = math.exp %86 : vector<2x8xf32>
    %88 = arith.addf %74, %87 : vector<2x8xf32>
    %c4_i32 = arith.constant 4 : i32
    %89 = vector.broadcast %c4_i32 : i32 to vector<2x8xi32>
    %90 = arith.cmpi eq, %3, %89 : vector<2x8xi32>
    %91 = arith.select %90, %85, %77 : vector<2x8xi1>, vector<2x8xf32>
    %92 = arith.cmpf oeq, %85, %23 : vector<2x8xf32>
    %c4_i32_40 = arith.constant 4 : i32
    %c5_i32_41 = arith.constant 5 : i32
    %93 = vector.broadcast %c4_i32_40 : i32 to vector<2x8xi32>
    %94 = vector.broadcast %c5_i32_41 : i32 to vector<2x8xi32>
    %95 = arith.select %92, %93, %94 : vector<2x8xi1>, vector<2x8xi32>
    %96 = arith.minsi %82, %95 : vector<2x8xi32>
    %97 = math.log %88 : vector<2x8xf32>
    %98 = arith.addf %23, %97 : vector<2x8xf32>
    %99 = arith.subf %98, %91 : vector<2x8xf32>
    %c4_i32_42 = arith.constant 4 : i32
    %100 = vector.broadcast %c4_i32_42 : i32 to vector<2x8xi32>
    %101 = arith.cmpi eq, %3, %100 : vector<2x8xi32>
    %cst_43 = arith.constant 1.000000e-01 : f32
    %cst_44 = arith.constant 1.000000e+00 : f32
    %102 = vector.broadcast %cst_43 : f32 to vector<2x8xf32>
    %103 = vector.broadcast %cst_44 : f32 to vector<2x8xf32>
    %104 = arith.select %101, %102, %103 : vector<2x8xi1>, vector<2x8xf32>
    %105 = arith.cmpi eq, %96, %3 : vector<2x8xi32>
    %106 = arith.extui %105 : vector<2x8xi1> to vector<2x8xi32>
    %107 = arith.sitofp %106 : vector<2x8xi32> to vector<2x8xf32>
    %108 = arith.mulf %4, %107 : vector<2x8xf32>
    %c4_i32_45 = arith.constant 4 : i32
    %109 = vector.broadcast %c4_i32_45 : i32 to vector<2x8xi32>
    %110 = arith.cmpi ne, %96, %109 : vector<2x8xi32>
    %111 = arith.extui %110 : vector<2x8xi1> to vector<2x8xi32>
    %112 = arith.sitofp %111 : vector<2x8xi32> to vector<2x8xf32>
    %113 = arith.mulf %104, %99 : vector<2x8xf32>
    %114 = vector.shape_cast %113 : vector<2x8xf32> to vector<1x2x8xf32>
    %115 = vector.shape_cast %104 : vector<2x8xf32> to vector<1x2x8xf32>
    %116 = vector.shape_cast %108 : vector<2x8xf32> to vector<1x2x8xf32>
    %117 = vector.shape_cast %4 : vector<2x8xf32> to vector<1x2x8xf32>
    %118 = vector.shape_cast %112 : vector<2x8xf32> to vector<1x2x8xf32>
    %119 = tpu.concatenate %114, %115, %116, %117, %118 in 0 : vector<1x2x8xf32>, vector<1x2x8xf32>, vector<1x2x8xf32>, vector<1x2x8xf32>, vector<1x2x8xf32> -> vector<5x2x8xf32>
    %c0_46 = arith.constant 0 : index
    %c0_47 = arith.constant 0 : index
    %c0_48 = arith.constant 0 : index
    %120 = vector.load %arg13[%c0_46, %c0_47, %c0_48] : memref<5x2x1xf32, #tpu.memory_space<vmem>>, vector<5x2x1xf32>
    %cst_49 = arith.constant dense<0.000000e+00> : vector<5x2xf32>
    %121 = vector.multi_reduction <add>, %119, %cst_49 [2] : vector<5x2x8xf32> to vector<5x2xf32>
    %122 = vector.shape_cast %121 : vector<5x2xf32> to vector<5x2x1xf32>
    %123 = arith.addf %120, %122 : vector<5x2x1xf32>
    %c0_50 = arith.constant 0 : index
    %c0_51 = arith.constant 0 : index
    %c0_52 = arith.constant 0 : index
    %124 = vector.load %arg13[%c0_50, %c0_51, %c0_52] : memref<5x2x1xf32, #tpu.memory_space<vmem>>, vector<5x2x1xf32>
    tpu.vector_store %arg13[%c0_50, %c0_51, %c0_52], %123 {strides = array<i32>} : memref<5x2x1xf32, #tpu.memory_space<vmem>>, vector<5x2x1xf32>,
    %c0_i32_53 = arith.constant 0 : i32
    %125 = arith.cmpi eq, %arg0, %c0_i32_53 : i32
    %126 = arith.extui %125 : i1 to i32
    %c0_i32_54 = arith.constant 0 : i32
    %127 = arith.cmpi ne, %126, %c0_i32_54 : i32
    scf.if %127 {
      %c0_55 = arith.constant 0 : index
      %c0_56 = arith.constant 0 : index
      %c0_57 = arith.constant 0 : index
      %128 = vector.load %arg13[%c0_55, %c0_56, %c0_57] : memref<5x2x1xf32, #tpu.memory_space<vmem>>, vector<5x2x1xf32>
      %129 = vector.extract_strided_slice %128 {offsets = [0, 0, 0], sizes = [1, 2, 1], strides = [1, 1, 1]} : vector<5x2x1xf32> to vector<1x2x1xf32>
      %130 = vector.shape_cast %129 : vector<1x2x1xf32> to vector<2x1xf32>
      %131 = vector.shape_cast %130 : vector<2x1xf32> to vector<1x2x1xf32>
      %cst_58 = arith.constant dense<0.000000e+00> : vector<1xf32>
      %132 = vector.multi_reduction <add>, %131, %cst_58 [1, 2] : vector<1x2x1xf32> to vector<1xf32>
      %133 = vector.shape_cast %132 : vector<1xf32> to vector<1x1x1xf32>
      %134 = vector.extract %133[0, 0, 0] : f32 from vector<1x1x1xf32>
      %135 = vector.extract_strided_slice %128 {offsets = [1, 0, 0], sizes = [1, 2, 1], strides = [1, 1, 1]} : vector<5x2x1xf32> to vector<1x2x1xf32>
      %136 = vector.shape_cast %135 : vector<1x2x1xf32> to vector<2x1xf32>
      %137 = vector.shape_cast %136 : vector<2x1xf32> to vector<1x2x1xf32>
      %cst_59 = arith.constant dense<0.000000e+00> : vector<1xf32>
      %138 = vector.multi_reduction <add>, %137, %cst_59 [1, 2] : vector<1x2x1xf32> to vector<1xf32>
      %139 = vector.shape_cast %138 : vector<1xf32> to vector<1x1x1xf32>
      %140 = vector.extract %139[0, 0, 0] : f32 from vector<1x1x1xf32>
      %141 = vector.extract_strided_slice %128 {offsets = [2, 0, 0], sizes = [1, 2, 1], strides = [1, 1, 1]} : vector<5x2x1xf32> to vector<1x2x1xf32>
      %142 = vector.shape_cast %141 : vector<1x2x1xf32> to vector<2x1xf32>
      %143 = vector.shape_cast %142 : vector<2x1xf32> to vector<1x2x1xf32>
      %cst_60 = arith.constant dense<0.000000e+00> : vector<1xf32>
      %144 = vector.multi_reduction <add>, %143, %cst_60 [1, 2] : vector<1x2x1xf32> to vector<1xf32>
      %145 = vector.shape_cast %144 : vector<1xf32> to vector<1x1x1xf32>
      %146 = vector.extract %145[0, 0, 0] : f32 from vector<1x1x1xf32>
      %147 = vector.extract_strided_slice %128 {offsets = [3, 0, 0], sizes = [1, 2, 1], strides = [1, 1, 1]} : vector<5x2x1xf32> to vector<1x2x1xf32>
      %148 = vector.shape_cast %147 : vector<1x2x1xf32> to vector<2x1xf32>
      %149 = vector.shape_cast %148 : vector<2x1xf32> to vector<1x2x1xf32>
      %cst_61 = arith.constant dense<0.000000e+00> : vector<1xf32>
      %150 = vector.multi_reduction <add>, %149, %cst_61 [1, 2] : vector<1x2x1xf32> to vector<1xf32>
      %151 = vector.shape_cast %150 : vector<1xf32> to vector<1x1x1xf32>
      %152 = vector.extract %151[0, 0, 0] : f32 from vector<1x1x1xf32>
      %153 = vector.extract_strided_slice %128 {offsets = [4, 0, 0], sizes = [1, 2, 1], strides = [1, 1, 1]} : vector<5x2x1xf32> to vector<1x2x1xf32>
      %154 = vector.shape_cast %153 : vector<1x2x1xf32> to vector<2x1xf32>
      %155 = arith.divf %134, %140 : f32
      %c0_62 = arith.constant 0 : index
      %156 = memref.load %arg12[%c0_62] : memref<8xf32, #tpu.memory_space<smem>>
      memref.store %155, %arg12[%c0_62] : memref<8xf32, #tpu.memory_space<smem>>
      %cst_63 = arith.constant 1.000000e+02 : f32
      %157 = arith.mulf %cst_63, %146 : f32
      %cst_64 = arith.constant 1.000000e+00 : f32
      %158 = arith.maximumf %152, %cst_64 : f32
      %159 = arith.divf %157, %158 : f32
      %cst_65 = arith.constant 1.000000e+02 : f32
      %160 = arith.subf %cst_65, %159 : f32
      %c1_66 = arith.constant 1 : index
      %161 = memref.load %arg12[%c1_66] : memref<8xf32, #tpu.memory_space<smem>>
      memref.store %160, %arg12[%c1_66] : memref<8xf32, #tpu.memory_space<smem>>
      %c0_67 = arith.constant 0 : index
      %c0_68 = arith.constant 0 : index
      %162 = vector.load %arg4[%c0_67, %c0_68] : memref<2x1xf32, #tpu.memory_space<vmem>>, vector<2x1xf32>
      %163 = arith.subf %154, %162 : vector<2x1xf32>
      %164 = math.absf %163 : vector<2x1xf32>
      %165 = vector.shape_cast %164 : vector<2x1xf32> to vector<1x2x1xf32>
      %cst_69 = arith.constant dense<0.000000e+00> : vector<1xf32>
      %166 = vector.multi_reduction <add>, %165, %cst_69 [1, 2] : vector<1x2x1xf32> to vector<1xf32>
      %167 = vector.shape_cast %166 : vector<1xf32> to vector<1x1x1xf32>
      %168 = vector.extract %167[0, 0, 0] : f32 from vector<1x1x1xf32>
      %cst_70 = arith.constant 5.000000e-01 : f32
      %169 = arith.mulf %168, %cst_70 : f32
      %c2_71 = arith.constant 2 : index
      %170 = memref.load %arg12[%c2_71] : memref<8xf32, #tpu.memory_space<smem>>
      memref.store %169, %arg12[%c2_71] : memref<8xf32, #tpu.memory_space<smem>>
      %c0_72 = arith.constant 0 : index
      %c0_73 = arith.constant 0 : index
      %171 = vector.load %arg11[%c0_72, %c0_73] : memref<8x6xf32, #tpu.memory_space<vmem>>, vector<8x6xf32>
      %cst_74 = arith.constant 0.000000e+00 : f32
      %172 = vector.broadcast %cst_74 : f32 to vector<8x6xf32>
      %173 = arith.cmpf ogt, %171, %172 : vector<8x6xf32>
      %174 = arith.extui %173 : vector<8x6xi1> to vector<8x6xi32>
      %175 = arith.sitofp %174 : vector<8x6xi32> to vector<8x6xf32>
      %cst_75 = arith.constant dense<0.000000e+00> : vector<6xf32>
      %176 = vector.multi_reduction <add>, %175, %cst_75 [0] : vector<8x6xf32> to vector<6xf32>
      %177 = vector.shape_cast %176 : vector<6xf32> to vector<1x6xf32>
      %178 = vector.shape_cast %177 : vector<1x6xf32> to vector<1x1x6xf32>
      %cst_76 = arith.constant dense<0x7F800000> : vector<1xf32>
      %179 = vector.multi_reduction <minimumf>, %178, %cst_76 [1, 2] : vector<1x1x6xf32> to vector<1xf32>
      %180 = vector.shape_cast %179 : vector<1xf32> to vector<1x1x1xf32>
      %181 = vector.extract %180[0, 0, 0] : f32 from vector<1x1x1xf32>
      %182 = math.sqrt %181 : f32
      %cst_77 = arith.constant 1.000000e+00 : f32
      %183 = vector.broadcast %cst_77 : f32 to vector<1x6xf32>
      %184 = arith.maximumf %177, %183 : vector<1x6xf32>
      %185 = math.rsqrt %184 : vector<1x6xf32>
      %186 = vector.broadcast %182 : f32 to vector<1x6xf32>
      %187 = arith.mulf %186, %185 : vector<1x6xf32>
      %188 = vector.broadcast %187 : vector<1x6xf32> to vector<8x6xf32>
      %189 = arith.mulf %188, %175 : vector<8x6xf32>
      %c0_78 = arith.constant 0 : index
      %c0_79 = arith.constant 0 : index
      %190 = vector.load %arg9[%c0_78, %c0_79] : memref<8x6xf32, #tpu.memory_space<vmem>>, vector<8x6xf32>
      %c0_80 = arith.constant 0 : index
      %c0_81 = arith.constant 0 : index
      %c0_82 = arith.constant 0 : index
      %191 = vector.load %arg6[%c0_80, %c0_81, %c0_82] : memref<4x8x6xf32, #tpu.memory_space<vmem>>, vector<4x8x6xf32>
      %c0_83 = arith.constant 0 : index
      %c0_84 = arith.constant 0 : index
      %c0_85 = arith.constant 0 : index
      %192 = vector.load %arg7[%c0_83, %c0_84, %c0_85] : memref<4x8x6xf32, #tpu.memory_space<vmem>>, vector<4x8x6xf32>
      %193 = vector.extract_strided_slice %191 {offsets = [0, 0, 0], sizes = [1, 8, 6], strides = [1, 1, 1]} : vector<4x8x6xf32> to vector<1x8x6xf32>
      %194 = vector.shape_cast %193 : vector<1x8x6xf32> to vector<8x6xf32>
      %195 = arith.mulf %194, %190 : vector<8x6xf32>
      %196 = vector.extract_strided_slice %191 {offsets = [1, 0, 0], sizes = [1, 8, 6], strides = [1, 1, 1]} : vector<4x8x6xf32> to vector<1x8x6xf32>
      %197 = vector.shape_cast %196 : vector<1x8x6xf32> to vector<8x6xf32>
      %198 = arith.addf %195, %197 : vector<8x6xf32>
      %199 = arith.mulf %198, %190 : vector<8x6xf32>
      %200 = vector.extract_strided_slice %191 {offsets = [2, 0, 0], sizes = [1, 8, 6], strides = [1, 1, 1]} : vector<4x8x6xf32> to vector<1x8x6xf32>
      %201 = vector.shape_cast %200 : vector<1x8x6xf32> to vector<8x6xf32>
      %202 = arith.addf %199, %201 : vector<8x6xf32>
      %203 = arith.mulf %202, %190 : vector<8x6xf32>
      %204 = vector.extract_strided_slice %191 {offsets = [3, 0, 0], sizes = [1, 8, 6], strides = [1, 1, 1]} : vector<4x8x6xf32> to vector<1x8x6xf32>
      %205 = vector.shape_cast %204 : vector<1x8x6xf32> to vector<8x6xf32>
      %206 = arith.addf %203, %205 : vector<8x6xf32>
      %207 = vector.extract_strided_slice %192 {offsets = [0, 0, 0], sizes = [1, 8, 6], strides = [1, 1, 1]} : vector<4x8x6xf32> to vector<1x8x6xf32>
      %208 = vector.shape_cast %207 : vector<1x8x6xf32> to vector<8x6xf32>
      %209 = arith.mulf %208, %190 : vector<8x6xf32>
      %210 = vector.extract_strided_slice %192 {offsets = [1, 0, 0], sizes = [1, 8, 6], strides = [1, 1, 1]} : vector<4x8x6xf32> to vector<1x8x6xf32>
      %211 = vector.shape_cast %210 : vector<1x8x6xf32> to vector<8x6xf32>
      %212 = arith.addf %209, %211 : vector<8x6xf32>
      %213 = arith.mulf %212, %190 : vector<8x6xf32>
      %214 = vector.extract_strided_slice %192 {offsets = [2, 0, 0], sizes = [1, 8, 6], strides = [1, 1, 1]} : vector<4x8x6xf32> to vector<1x8x6xf32>
      %215 = vector.shape_cast %214 : vector<1x8x6xf32> to vector<8x6xf32>
      %216 = arith.addf %213, %215 : vector<8x6xf32>
      %217 = arith.mulf %216, %190 : vector<8x6xf32>
      %218 = vector.extract_strided_slice %192 {offsets = [3, 0, 0], sizes = [1, 8, 6], strides = [1, 1, 1]} : vector<4x8x6xf32> to vector<1x8x6xf32>
      %219 = vector.shape_cast %218 : vector<1x8x6xf32> to vector<8x6xf32>
      %220 = arith.addf %217, %219 : vector<8x6xf32>
      %c0_86 = arith.constant 0 : index
      %c0_87 = arith.constant 0 : index
      %221 = vector.load %arg8[%c0_86, %c0_87] : memref<8x6xf32, #tpu.memory_space<vmem>>, vector<8x6xf32>
      %222 = arith.subf %206, %221 : vector<8x6xf32>
      %223 = math.absf %222 : vector<8x6xf32>
      %224 = arith.mulf %223, %189 : vector<8x6xf32>
      %225 = vector.shape_cast %224 : vector<8x6xf32> to vector<1x8x6xf32>
      %cst_88 = arith.constant dense<0.000000e+00> : vector<1xf32>
      %226 = vector.multi_reduction <add>, %225, %cst_88 [1, 2] : vector<1x8x6xf32> to vector<1xf32>
      %227 = vector.shape_cast %226 : vector<1xf32> to vector<1x1x1xf32>
      %228 = vector.extract %227[0, 0, 0] : f32 from vector<1x1x1xf32>
      %c0_89 = arith.constant 0 : index
      %c0_90 = arith.constant 0 : index
      %229 = vector.load %arg10[%c0_89, %c0_90] : memref<8x6xf32, #tpu.memory_space<vmem>>, vector<8x6xf32>
      %230 = arith.subf %220, %229 : vector<8x6xf32>
      %231 = math.absf %230 : vector<8x6xf32>
      %232 = arith.mulf %231, %189 : vector<8x6xf32>
      %233 = vector.shape_cast %232 : vector<8x6xf32> to vector<1x8x6xf32>
      %cst_91 = arith.constant dense<0.000000e+00> : vector<1xf32>
      %234 = vector.multi_reduction <add>, %233, %cst_91 [1, 2] : vector<1x8x6xf32> to vector<1xf32>
      %235 = vector.shape_cast %234 : vector<1xf32> to vector<1x1x1xf32>
      %236 = vector.extract %235[0, 0, 0] : f32 from vector<1x1x1xf32>
      %c0_92 = arith.constant 0 : index
      %c0_93 = arith.constant 0 : index
      %237 = vector.load %arg5[%c0_92, %c0_93] : memref<4x6xf32, #tpu.memory_space<vmem>>, vector<4x6xf32>
      %238 = vector.extract_strided_slice %237 {offsets = [0, 0], sizes = [1, 6], strides = [1, 1]} : vector<4x6xf32> to vector<1x6xf32>
      %239 = vector.extract_strided_slice %237 {offsets = [2, 0], sizes = [1, 6], strides = [1, 1]} : vector<4x6xf32> to vector<1x6xf32>
      %240 = arith.subf %238, %239 : vector<1x6xf32>
      %241 = math.absf %240 : vector<1x6xf32>
      %242 = vector.shape_cast %241 : vector<1x6xf32> to vector<1x1x6xf32>
      %cst_94 = arith.constant dense<0.000000e+00> : vector<1xf32>
      %243 = vector.multi_reduction <add>, %242, %cst_94 [1, 2] : vector<1x1x6xf32> to vector<1xf32>
      %244 = vector.shape_cast %243 : vector<1xf32> to vector<1x1x1xf32>
      %245 = vector.extract %244[0, 0, 0] : f32 from vector<1x1x1xf32>
      %246 = vector.extract_strided_slice %237 {offsets = [1, 0], sizes = [1, 6], strides = [1, 1]} : vector<4x6xf32> to vector<1x6xf32>
      %247 = vector.extract_strided_slice %237 {offsets = [3, 0], sizes = [1, 6], strides = [1, 1]} : vector<4x6xf32> to vector<1x6xf32>
      %248 = arith.subf %246, %247 : vector<1x6xf32>
      %249 = math.absf %248 : vector<1x6xf32>
      %250 = vector.shape_cast %249 : vector<1x6xf32> to vector<1x1x6xf32>
      %cst_95 = arith.constant dense<0.000000e+00> : vector<1xf32>
      %251 = vector.multi_reduction <add>, %250, %cst_95 [1, 2] : vector<1x1x6xf32> to vector<1xf32>
      %252 = vector.shape_cast %251 : vector<1xf32> to vector<1x1x1xf32>
      %253 = vector.extract %252[0, 0, 0] : f32 from vector<1x1x1xf32>
      %cst_96 = arith.constant 0.166666672 : f32
      %254 = arith.mulf %245, %cst_96 : f32
      %c3_97 = arith.constant 3 : index
      %255 = memref.load %arg12[%c3_97] : memref<8xf32, #tpu.memory_space<smem>>
      memref.store %254, %arg12[%c3_97] : memref<8xf32, #tpu.memory_space<smem>>
      %cst_98 = arith.constant 0.166666672 : f32
      %256 = arith.mulf %253, %cst_98 : f32
      %c4_99 = arith.constant 4 : index
      %257 = memref.load %arg12[%c4_99] : memref<8xf32, #tpu.memory_space<smem>>
      memref.store %256, %arg12[%c4_99] : memref<8xf32, #tpu.memory_space<smem>>
      %cst_100 = arith.constant 0.166666672 : f32
      %258 = arith.mulf %228, %cst_100 : f32
      %c5 = arith.constant 5 : index
      %259 = memref.load %arg12[%c5] : memref<8xf32, #tpu.memory_space<smem>>
      memref.store %258, %arg12[%c5] : memref<8xf32, #tpu.memory_space<smem>>
      %cst_101 = arith.constant 0.166666672 : f32
      %260 = arith.mulf %236, %cst_101 : f32
      %c6 = arith.constant 6 : index
      %261 = memref.load %arg12[%c6] : memref<8xf32, #tpu.memory_space<smem>>
      memref.store %260, %arg12[%c6] : memref<8xf32, #tpu.memory_space<smem>>
      %cst_102 = arith.constant 0.000000e+00 : f32
      %c7 = arith.constant 7 : index
      %262 = memref.load %arg12[%c7] : memref<8xf32, #tpu.memory_space<smem>>
      memref.store %cst_102, %arg12[%c7] : memref<8xf32, #tpu.memory_space<smem>>
    } else {
    }
    return
  }
  func.func @transform_0(%arg0: i32) -> (i32, i32, i32) {
    %c0_i32 = arith.constant 0 : i32
    %c0_i32_0 = arith.constant 0 : i32
    %c0_i32_1 = arith.constant 0 : i32
    return %c0_i32, %c0_i32_0, %arg0 : i32, i32, i32
  }
  func.func @transform_1(%arg0: i32) -> (i32, i32) {
    %c0_i32 = arith.constant 0 : i32
    %c0_i32_0 = arith.constant 0 : i32
    return %c0_i32, %arg0 : i32, i32
  }
  func.func @transform_2(%arg0: i32) -> (i32, i32) {
    %c0_i32 = arith.constant 0 : i32
    %c0_i32_0 = arith.constant 0 : i32
    return %c0_i32, %arg0 : i32, i32
  }
  func.func @transform_3(%arg0: i32) -> (i32, i32) {
    %c0_i32 = arith.constant 0 : i32
    %c0_i32_0 = arith.constant 0 : i32
    %c0_i32_1 = arith.constant 0 : i32
    return %c0_i32, %c0_i32_0 : i32, i32
  }
  func.func @transform_4(%arg0: i32) -> (i32, i32) {
    %c0_i32 = arith.constant 0 : i32
    %c0_i32_0 = arith.constant 0 : i32
    %c0_i32_1 = arith.constant 0 : i32
    return %c0_i32, %c0_i32_0 : i32, i32
  }
  func.func @transform_5(%arg0: i32) -> (i32, i32, i32) {
    %c0_i32 = arith.constant 0 : i32
    %c0_i32_0 = arith.constant 0 : i32
    %c0_i32_1 = arith.constant 0 : i32
    %c0_i32_2 = arith.constant 0 : i32
    return %c0_i32, %c0_i32_0, %c0_i32_1 : i32, i32, i32
  }
  func.func @transform_6(%arg0: i32) -> (i32, i32, i32) {
    %c0_i32 = arith.constant 0 : i32
    %c0_i32_0 = arith.constant 0 : i32
    %c0_i32_1 = arith.constant 0 : i32
    %c0_i32_2 = arith.constant 0 : i32
    return %c0_i32, %c0_i32_0, %c0_i32_1 : i32, i32, i32
  }
  func.func @transform_7(%arg0: i32) -> (i32, i32) {
    %c0_i32 = arith.constant 0 : i32
    %c0_i32_0 = arith.constant 0 : i32
    %c0_i32_1 = arith.constant 0 : i32
    return %c0_i32, %c0_i32_0 : i32, i32
  }
  func.func @transform_8(%arg0: i32) -> (i32, i32) {
    %c0_i32 = arith.constant 0 : i32
    %c0_i32_0 = arith.constant 0 : i32
    %c0_i32_1 = arith.constant 0 : i32
    return %c0_i32, %c0_i32_0 : i32, i32
  }
  func.func @transform_9(%arg0: i32) -> (i32, i32) {
    %c0_i32 = arith.constant 0 : i32
    %c0_i32_0 = arith.constant 0 : i32
    %c0_i32_1 = arith.constant 0 : i32
    return %c0_i32, %c0_i32_0 : i32, i32
  }
  func.func @transform_10(%arg0: i32) -> (i32, i32) {
    %c0_i32 = arith.constant 0 : i32
    %c0_i32_0 = arith.constant 0 : i32
    %c0_i32_1 = arith.constant 0 : i32
    return %c0_i32, %c0_i32_0 : i32, i32
  }
  func.func @transform_11(%arg0: i32) -> i32 {
    %c0_i32 = arith.constant 0 : i32
    %c0_i32_0 = arith.constant 0 : i32
    return %c0_i32 : i32
  }
}

</mosaic_0001>

<bundles_post_ra>
// kernel: tpu_custom_call.1
= control target key start
LH: loop header
LB: loop body
LE: loop exit
PB: predicated region body
PF: predicated region fallthrough
CT: control target
= control target key end

     0   :  { %s665_s0 = inlined_call_operand.vmem [shape: bf16[5,2,8], index: 0, kind: input, shape index: {}]   ;;  %s666_s1 = inlined_call_operand.vmem [shape: s32[2,8], index: 1, kind: input, shape index: {}]   ;;  %s667_s2 = inlined_call_operand.vmem [shape: f32[2,8], index: 2, kind: input, shape index: {}]   ;;  %s668_s3 = inlined_call_operand.vmem [shape: f32[2,1], index: 3, kind: input, shape index: {}]   ;;  %s669_s4 = inlined_call_operand.vmem [shape: f32[4,6], index: 4, kind: input, shape index: {}]   ;;  %s670_s5 = inlined_call_operand.vmem [shape: f32[4,8,6], index: 5, kind: input, shape index: {}]   ;;  %s671_s6 = inlined_call_operand.vmem [shape: f32[4,8,6], index: 6, kind: input, shape index: {}]   ;;  %s672_s7 = inlined_call_operand.vmem [shape: f32[8,6], index: 7, kind: input, shape index: {}]   ;;  %s673_s8 = inlined_call_operand.vmem [shape: f32[8,6], index: 8, kind: input, shape index: {}]   ;;  %s674_s9 = inlined_call_operand.vmem [shape: f32[8,6], index: 9, kind: input, shape index: {}]   ;;  %s675_s10 = inlined_call_operand.vmem [shape: f32[8,6], index: 10, kind: input, shape index: {}]   ;;  %s676_s11 = inlined_call_operand.hbm [shape: f32[8], index: 11, kind: output, shape index: {}]  }
   0x1   :  { %v51_v0 = vld [vmem:[%s665_s0] sm:$0x1]  ;;  %v378_v1 = vld [vmem:[%s665_s0 + $0x1] sm:$0x1]  ;;  %v379_v4 = vld [vmem:[%s665_s0 + $0x2] sm:$0x1] }
   0x2   :  { %v521_v2 = vunpack.c.l.bf16 %v51_v0  ;;  %v523_v3 = vunpack.c.l.bf16 %v378_v1  ;;  %v380_v5 = vld [vmem:[%s665_s0 + $0x3] sm:$0x1]  ;;  %v531_v6 = vunpack.c.l.bf16 %v379_v4  ;;  %v381_v7 = vld [vmem:[%s665_s0 + $0x4] sm:$0x1] }
   0x3   :  { %16 = vsyncpa [#allocation4], 0  ;;  %v538_v9 = vunpack.c.l.bf16 %v380_v5  ;;  %v541_v11 = vunpack.c.l.bf16 %v381_v7  ;;  %v449_v23 = vmov 5   ;;  %v49_v34 = vld [vmem:[%s666_s1] sm:$0x3]  ;;  %v450_v38 = vmov 0.0  }
   0x4   :  { %v56_v8 = vmax.f32 %v521_v2, %v523_v3  ;;  %v50_v35 = vld [vmem:[%s667_s2] sm:$0x3]  ;;  %vm136_vm10 = vcmask 58368   ;;  %vm73_vm11 = vcmp.eq.s32.totalorder %v49_v34, 0  ;;  %vm82_vm12 = vcmp.eq.s32.totalorder %v49_v34, 1  ;;  %s452_s15 = smov 1.0  }
   0x5   :  { %v146_v48 = vsel %vm136_vm10, %v50_v35, 0.0  ;;  %v74_v51 = vsel %vm73_vm11, %v521_v2, 0.0  ;;  %vm92_vm13 = vcmp.eq.s32.totalorder %v49_v34, 2  ;;  %vm102_vm14 = vcmp.eq.s32.totalorder %v49_v34, 3  ;;  %s437_s2 = scalar_lea.hbm %s676_s11, 16 }
   0x6   :  { %v60_v10 = vmax.f32 %v56_v8, %v531_v6  ;;  %v83_v52 = vsel %vm82_vm12, %v523_v3, %v74_v51  ;;  %vm112_vm15 = vcmp.eq.s32.totalorder %v49_v34, 4  ;;  %v451_v59 = vmov 1.0   ;;  %p438_p0 = scmp.ne.s32.totalorder %s676_s11, %s437_s2  ;;  %p441_p1 = scmp.lt.u32.totalorder %s437_s2, %s676_s11 }
   0x7   :  { %v93_v53 = vsel %vm92_vm13, %v531_v6, %v83_v52  ;;  %v122_v60 = vsel %vm112_vm15, 0.1, %v451_v59 }
   0x8   :  { %v64_v12 = vmax.f32 %v60_v10, %v538_v9  ;;  %v103_v54 = vsel %vm102_vm14, %v538_v9, %v93_v53  ;;  %v140_v0 = vsel %vm136_vm10, %v122_v60, 0.0  ;;  %p443_p2 = pnand %p441_p1, %p438_p0 }
   0x9   :  { %v113_v57 = vsel %vm112_vm15, %v541_v11, %v103_v54 }
   0xa   :  { %v545_v13 = vmax.f32 %v64_v12, %v541_v11 }
   0xc   :  { %v69_v14 = vsub.f32 %v521_v2, %v545_v13  ;;  %v78_v15 = vsub.f32 %v523_v3, %v545_v13  ;;  %v88_v16 = vsub.f32 %v531_v6, %v545_v13  ;;  %v98_v17 = vsub.f32 %v538_v9, %v545_v13 }
   0xd   :  { %v108_v18 = vsub.f32 %v541_v11, %v545_v13  ;;  %vm75_vm0 = vcmp.eq.f32.partialorder %v521_v2, %v545_v13  ;;  %vm84_vm1 = vcmp.eq.f32.partialorder %v523_v3, %v545_v13  ;;  %vm94_vm2 = vcmp.eq.f32.partialorder %v531_v6, %v545_v13 }
   0xe   :  { %v70_v19 = vmul.f32 1.442695, %v69_v14  ;;  %v79_v20 = vmul.f32 1.442695, %v78_v15  ;;  %v89_v21 = vmul.f32 1.442695, %v88_v16  ;;  %vm104_vm3 = vcmp.eq.f32.partialorder %v538_v9, %v545_v13 }
   0xf   :  { %v99_v22 = vmul.f32 1.442695, %v98_v17  ;;  %v76_v24 = vsel %vm75_vm0, 0, %v449_v23  ;;  %v85_v25 = vsel %vm84_vm1, 1, %v449_v23  ;;  %v95_v27 = vsel %vm94_vm2, 2, %v449_v23  ;;  %v242_v9 = vld [vmem:[%s675_s10] sm:$0xff] }
  0x10   :  { %417 = vpow2.f32 %v70_v19  ;;  %v77_v26 = vsel %vm75_vm0, %v76_v24, 5  ;;  %v109_v28 = vmul.f32 1.442695, %v108_v18  ;;  %vm114_vm5 = vcmp.eq.f32.partialorder %v541_v11, %v545_v13 }
  0x11   :  { %419 = vpow2.f32 %v79_v20  ;;  %vm86_vm4 = vcmp.lt.s32.totalorder %v77_v26, %v85_v25  ;;  %v105_v30 = vsel %vm104_vm3, 3, %v449_v23  ;;  %v115_v32 = vsel %vm114_vm5, 4, %v449_v23 }
  0x12   :  { %421 = vpow2.f32 %v89_v21  ;;  %v87_v29 = vsel %vm86_vm4, %v77_v26, %v85_v25  ;;  %vm43_vm1 = vcmask 1024   ;;  %vm243_vm2 = vcmp.gt.f32.partialorder %v242_v9, 0.0 }
  0x13   :  { %423 = vpow2.f32 %v99_v22  ;;  %vm96_vm6 = vcmp.lt.s32.totalorder %v87_v29, %v95_v27  ;;  %44 = vst.msk [vmem:[#allocation2] sm:$0x3] %vm43_vm1, %v450_v38  ;;  %45 = vst.msk [vmem:[#allocation2 + $0x2] sm:$0x3] %vm43_vm1, %v450_v38  ;;  %v594_v10 = vsel %vm243_vm2, 1.0, %v450_v38  ;;  %vm246_vm3 = vcmask 48128  }
  0x14   :  { %v97_v31 = vsel %vm96_vm6, %v87_v29, %v95_v27  ;;  %425 = vpow2.f32 %v109_v28  ;;  %46 = vst.msk [vmem:[#allocation2 + $0x4] sm:$0x3] %vm43_vm1, %v450_v38  ;;  %47 = vst.msk [vmem:[#allocation2 + $0x6] sm:$0x3] %vm43_vm1, %v450_v38  ;;  %v247_v11 = vsel %vm246_vm3, %v594_v10, 0.0  ;;  %vm327_vm6 = vcmask 40960  }
  0x15   :  { %vm106_vm7 = vcmp.lt.s32.totalorder %v97_v31, %v105_v30  ;;  %48 = vst.msk [vmem:[#allocation2 + $0x8] sm:$0x3] %vm43_vm1, %v450_v38  ;;  %v248_v12 = vrot.slane %v247_v11, 4 }
  0x16   :  { %v107_v33 = vsel %vm106_vm7, %v97_v31, %v105_v30 }
  0x17   :  { %vm116_vm8 = vcmp.lt.s32.totalorder %v107_v33, %v115_v32  ;;  %v249_v16 = vadd.f32 %v248_v12, %v247_v11 }
  0x18   :  { %v117_v36 = vsel %vm116_vm8, %v107_v33, %v115_v32  ;;  %v226_v33 = vld [vmem:[%s668_s3] sm:$0x3] }
  0x19   :  { %vm123_vm9 = vcmp.eq.s32.totalorder %v117_v36, %v49_v34  ;;  %vm127_vm0 = vcmp.ne.s32.totalorder %v117_v36, 4  ;;  %v250_v20 = vrot.slane %v249_v16, 2 }
  0x1a   :  { %v418_v37 = vpop.eup %417  ;;  %v382_v39 = vsel %vm123_vm9, 1.0, %v450_v38  ;;  %v383_v1 = vsel %vm127_vm0, 1.0, %v450_v38  ;;  %v132_v17 = vld [vmem:[#allocation2 + $0x2] sm:$0x3] }
  0x1b   :  { %v420_v40 = vpop.eup %419  ;;  %v126_v41 = vmul.f32 %v382_v39, %v50_v35  ;;  %v149_v2 = vsel %vm136_vm10, %v383_v1, 0.0  ;;  %v133_v3 = vld [vmem:[#allocation2 + $0x4] sm:$0x3]  ;;  %v134_v6 = vld [vmem:[#allocation2 + $0x6] sm:$0x3]  ;;  %v251_v24 = vadd.f32 %v250_v20, %v249_v16 }
  0x1c   :  { %v422_v42 = vpop.eup %421  ;;  %v81_v43 = vadd.f32 %v420_v40, %v418_v37  ;;  %v135_v21 = vld [vmem:[#allocation2 + $0x8] sm:$0x3] }
  0x1d   :  { %v424_v44 = vpop.eup %423  ;;  %v143_v45 = vsel %vm136_vm10, %v126_v41, 0.0  ;;  %v252_v29 = vrot.slane %v251_v24, 1 }
  0x1e   :  { %v91_v46 = vadd.f32 %v422_v42, %v81_v43  ;;  %144 = vadd.xlane.f32.xlu1 %v143_v45  ;;  %v426_v47 = vpop.eup %425 }
  0x1f   :  { %v608_v35 = vadd.f32 %v252_v29, %v251_v24  ;;  %v272_v24 = vld [vmem:[%s673_s8] sm:$0xff]  ;;  %v278_v29 = vld [vmem:[%s671_s6 + $0x8] sm:$0xff] }
  0x20   :  { %v101_v49 = vadd.f32 %v424_v44, %v91_v46 }
  0x21   :  { %v254_v39 = vsel %vm246_vm3, %v608_v35, inf }
  0x22   :  { %v111_v50 = vadd.f32 %v426_v47, %v101_v49  ;;  %147 = vadd.xlane.f32.xlu1 %v146_v48 }
  0x24   :  { %427 = vlog2.f32 %v111_v50 }
  0x2e   :  { %v428_v55 = vpop.eup %427 }
  0x2f   :  { %v119_v56 = vmul.f32 0.6931472, %v428_v55 }
  0x31   :  { %v120_v58 = vadd.f32 %v119_v56, %v545_v13  ;;  %v131_v13 = vld [vmem:[#allocation2] sm:$0x3] }
  0x33   :  { %v121_v61 = vsub.f32 %v120_v58, %v113_v57 }
  0x35   :  { %v130_v62 = vmul.f32 %v122_v60, %v121_v61 }
  0x37   :  { %v137_v63 = vsel %vm136_vm10, %v130_v62, 0.0 }
  0x38   :  { %138 = vadd.xlane.f32.xlu0 %v137_v63 }
  0x3c   :  { %141 = vadd.xlane.f32.xlu0 %v140_v0 }
  0x40   :  { %150 = vadd.xlane.f32.xlu0 %v149_v2 }
  0xab   :  { %v145_v4 = vpop.xlane.xlu1 %144 }
  0xac   :  { %v154_v5 = vadd.f32 %v145_v4, %v133_v3 }
  0xae   :  { %160 = vst.msk [vmem:[#allocation2 + $0x4] sm:$0x3] %vm43_vm1, %v154_v5 }
  0xaf   :  { %v148_v7 = vpop.xlane.xlu1 %147 }
  0xb0   :  { %v155_v8 = vadd.f32 %v148_v7, %v134_v6 }
  0xb2   :  { %161 = vst.msk [vmem:[#allocation2 + $0x6] sm:$0x3] %vm43_vm1, %v155_v8 }
  0xb5   :  { %v168_v26 = vld [vmem:[#allocation2 + $0x4] sm:$0x3] }
  0xb6   :  { %v191_v28 = vsel %vm43_vm1, %v168_v26, 0.0  ;;  %v273_v26 = vld [vmem:[%s670_s5] sm:$0xff] }
  0xb9   :  { %v169_v31 = vld [vmem:[#allocation2 + $0x6] sm:$0x3] }
  0xba   :  { %v201_v34 = vsel %vm43_vm1, %v169_v31, 0.0 }
  0xc5   :  { %v139_v14 = vpop.xlane.xlu0 %138 }
  0xc6   :  { %v152_v15 = vadd.f32 %v139_v14, %v131_v13 }
  0xc8   :  { %158 = vst.msk [vmem:[#allocation2] sm:$0x3] %vm43_vm1, %v152_v15 }
  0xc9   :  { %v142_v18 = vpop.xlane.xlu0 %141 }
  0xca   :  { %v153_v19 = vadd.f32 %v142_v18, %v132_v17 }
  0xcc   :  { %159 = vst.msk [vmem:[#allocation2 + $0x2] sm:$0x3] %vm43_vm1, %v153_v19 }
  0xcd   :  { %v151_v22 = vpop.xlane.xlu0 %150 }
  0xce   :  { %v156_v23 = vadd.f32 %v151_v22, %v135_v21 }
  0xcf   :  { %v166_v25 = vld [vmem:[#allocation2] sm:$0x3] }
  0xd0   :  { %v171_v27 = vsel %vm43_vm1, %v166_v25, 0.0  ;;  %162 = vst.msk [vmem:[#allocation2 + $0x8] sm:$0x3] %vm43_vm1, %v156_v23  ;;  %v277_v25 = vld [vmem:[%s671_s6] sm:$0xff] }
  0xd1   :  { %172 = vadd.xlane.f32.xlu1 %v171_v27  ;;  %v287_v27 = vmul.f32 %v277_v25, %v272_v24 }
  0xd3   :  { %v167_v30 = vld [vmem:[#allocation2 + $0x2] sm:$0x3]  ;;  %v288_v31 = vadd.f32 %v287_v27, %v278_v29 }
  0xd4   :  { %v181_v32 = vsel %vm43_vm1, %v167_v30, 0.0  ;;  %v274_v30 = vld [vmem:[%s670_s5 + $0x8] sm:$0xff] }
  0xd5   :  { %182 = vadd.xlane.f32.xlu0 %v181_v32  ;;  %192 = vadd.xlane.f32.xlu1 %v191_v28  ;;  %v281_v28 = vmul.f32 %v273_v26, %v272_v24 }
  0xd7   :  { %v170_v36 = vld [vmem:[#allocation2 + $0x8] sm:$0x3]  ;;  %v282_v32 = vadd.f32 %v281_v28, %v274_v30 }
  0xd8   :  { %v227_v37 = vsub.f32 %v170_v36, %v226_v33  ;;  %v289_v33 = vmul.f32 %v288_v31, %v272_v24  ;;  %v279_v36 = vld [vmem:[%s671_s6 + $0x10] sm:$0xff] }
  0xd9   :  { %202 = vadd.xlane.f32.xlu0 %v201_v34  ;;  %v283_v34 = vmul.f32 %v282_v32, %v272_v24 }
  0xda   :  { %v228_v38 = vand.u32 2147483647, %v227_v37  ;;  %v275_v37 = vld [vmem:[%s670_s5 + $0x10] sm:$0xff] }
  0xdc   :  { %v229_v40 = vsel %vm43_vm1, %v228_v38, 0.0  ;;  %v267_v38 = vmax.f32 %v608_v35, 1.0 }
  0xdd   :  { %230 = vadd.xlane.f32.xlu1 %v229_v40  ;;  %255 = vmin.xlane.f32.xlu0 %v254_v39  ;;  %v290_v39 = vadd.f32 %v289_v33, %v279_v36  ;;  %v284_v40 = vadd.f32 %v283_v34, %v275_v37 }
 0x15e   :  { %v173_v41 = vpop.xlane.xlu1 %172 }
 0x15f   :  { %v174_v42 = vrot.slane %v173_v41, 4 }
 0x161   :  { %v175_v43 = vadd.f32 %v174_v42, %v173_v41  ;;  %v291_v41 = vmul.f32 %v290_v39, %v272_v24  ;;  %v285_v42 = vmul.f32 %v284_v40, %v272_v24 }
 0x162   :  { %v183_v44 = vpop.xlane.xlu0 %182  ;;  %v193_v45 = vpop.xlane.xlu1 %192 }
 0x163   :  { %v176_v46 = vrot.slane %v175_v43, 2  ;;  %v184_v47 = vrot.slane %v183_v44, 4  ;;  %v194_v48 = vrot.slane %v193_v45, 4 }
 0x165   :  { %v185_v49 = vadd.f32 %v184_v47, %v183_v44  ;;  %v195_v50 = vadd.f32 %v194_v48, %v193_v45  ;;  %v177_v51 = vadd.f32 %v176_v46, %v175_v43  ;;  %v280_v43 = vld [vmem:[%s671_s6 + $0x18] sm:$0xff]  ;;  %v321_v45 = vld [vmem:[%s669_s4] sm:$0xf]  ;;  %s453_s4 = smov 0.0  }
 0x166   :  { %v203_v52 = vpop.xlane.xlu0 %202  ;;  %v276_v44 = vld [vmem:[%s670_s5 + $0x18] sm:$0xff]  ;;  %v292_v46 = vadd.f32 %v291_v41, %v280_v43  ;;  %v323_v35 = vrot.slane %v321_v45, 2  ;;  %v307_v48 = vld [vmem:[%s674_s9] sm:$0xff]  ;;  %364 = sst [smem:[#allocation3 + $0x7]] %s453_s4 }
 0x167   :  { %v186_v53 = vrot.slane %v185_v49, 2  ;;  %v196_v54 = vrot.slane %v195_v50, 2  ;;  %v204_v55 = vrot.slane %v203_v52, 4  ;;  %v178_v56 = vrot.slane %v177_v51, 1 }
 0x168   :  { %v286_v47 = vadd.f32 %v285_v42, %v276_v44 }
 0x169   :  { %v205_v57 = vadd.f32 %v204_v55, %v203_v52  ;;  %v179_v58 = vadd.f32 %v178_v56, %v177_v51  ;;  %v187_v59 = vadd.f32 %v186_v53, %v185_v49  ;;  %v197_v60 = vadd.f32 %v196_v54, %v195_v50  ;;  %v293_v49 = vld [vmem:[%s672_s7] sm:$0xff] }
 0x16a   :  { %v231_v5 = vpop.xlane.xlu1 %230  ;;  %v256_v16 = vpop.xlane.xlu0 %255  ;;  %v308_v50 = vsub.f32 %v292_v46, %v307_v48  ;;  %v294_v51 = vsub.f32 %v286_v47, %v293_v49  ;;  %v325_v52 = vsub.f32 %v321_v45, %v323_v35 }
 0x16b   :  { %v206_v61 = vrot.slane %v205_v57, 2  ;;  %385 = vpush %v179_v58  ;;  %v188_v62 = vrot.slane %v187_v59, 1  ;;  %v198_v63 = vrot.slane %v197_v60, 1  ;;  %v232_v6 = vrot.slane %v231_v5, 4 }
 0x16c   :  { %v309_v56 = vand.u32 2147483647, %v308_v50  ;;  %v326_v58 = vand.u32 2147483647, %v325_v52 }
 0x16d   :  { %v189_v0 = vadd.f32 %v188_v62, %v187_v59  ;;  %v199_v1 = vadd.f32 %v198_v63, %v197_v60  ;;  %v207_v2 = vadd.f32 %v206_v61, %v205_v57  ;;  %v233_v7 = vadd.f32 %v232_v6, %v231_v5 }
 0x16e   :  { %v295_v57 = vand.u32 2147483647, %v294_v51  ;;  %v339_v62 = vrot.slane %v326_v58, 1 }
 0x16f   :  { %387 = vpush %v189_v0  ;;  %v208_v3 = vrot.slane %v207_v2, 1  ;;  %v234_v9 = vrot.slane %v233_v7, 2 }
 0x170   :  { %389 = vpush %v199_v1  ;;  %v341_v1 = vsel %vm327_vm6, %v339_v62, 0.0 }
 0x171   :  { %v209_v4 = vadd.f32 %v208_v3, %v207_v2  ;;  %v235_v12 = vadd.f32 %v234_v9, %v233_v7  ;;  %v328_v2 = vsel %vm327_vm6, %v326_v58, 0.0 }
 0x173   :  { %391 = vpush %v209_v4  ;;  %v236_v14 = vrot.slane %v235_v12, 1 }
 0x175   :  { %v237_v17 = vadd.f32 %v236_v14, %v235_v12 }
 0x19c   :  { %s386_s3 = spop %385 }
 0x1a0   :  { %s388_s12 = spop %387 }
 0x1a1   :  { %v211_v8 = vstv %s388_s12  ;;  %s390_s13 = spop %389 }
 0x1a2   :  { %429 = vrcp.f32 %v211_v8  ;;  %s217_s19 = smul.f32 100.0, %s390_s13 }
 0x1a4   :  { %s392_s14 = spop %391 }
 0x1a5   :  { %s218_s16 = smax.f32 %s452_s15, %s392_s14 }
 0x1a6   :  { %v219_v11 = vstv %s218_s16 }
 0x1a7   :  { %431 = vrcp.f32 %v219_v11 }
 0x1ac   :  { %v430_v13 = vpop.eup %429 }
 0x1ad   :  { %393 = vpush %v430_v13 }
 0x1b1   :  { %v432_v15 = vpop.eup %431 }
 0x1b2   :  { %395 = vpush %v432_v15 }
 0x1b3   :  { %397 = vpush %v237_v17 }
 0x1b4   :  { %399 = vpush %v256_v16 }
 0x1de   :  { %s394_s17 = spop %393 }
 0x1df   :  { %s214_s18 = smul.f32 %s394_s17, %s386_s3 }
 0x1e1   :  { %216 = sst [smem:[#allocation3]] %s214_s18 }
 0x1e3   :  { %s396_s20 = spop %395 }
 0x1e4   :  { %s222_s21 = smul.f32 %s396_s20, %s217_s19  ;;  %s398_s22 = spop %397 }
 0x1e5   :  { %s239_s23 = smul.f32 0.5, %s398_s22  ;;  %s400_s24 = spop %399 }
 0x1e6   :  { %s223_s25 = ssub.f32 100.0, %s222_s21  ;;  %v258_v18 = vstv %s400_s24 }
 0x1e7   :  { %241 = sst [smem:[#allocation3 + $0x2]] %s239_s23  ;;  %433 = vrsqrt.f32 %v258_v18  ;;  %vm261_vm4 = vcmp.eq.f32.partialorder %v258_v18, inf  ;;  %v264_v21 = vand.u32 2147483648, %v258_v18  ;;  %vm263_vm5 = vcmp.eq.f32.partialorder %v258_v18, 0.0 }
 0x1e8   :  { %225 = sst [smem:[#allocation3 + $0x1]] %s223_s25  ;;  %435 = vrsqrt.f32 %v267_v38 }
 0x1f1   :  { %v434_v19 = vpop.eup %433 }
 0x1f2   :  { %v260_v20 = vmul.f32 %v434_v19, %v258_v18  ;;  %v436_v53 = vpop.eup %435 }
 0x1f4   :  { %v262_v22 = vsel %vm261_vm4, %v258_v18, %v260_v20 }
 0x1f5   :  { %v265_v23 = vsel %vm263_vm5, %v264_v21, %v262_v22 }
 0x1f6   :  { %401 = vpush %v265_v23 }
 0x227   :  { %s402_s5 = spop %401 }
 0x228   :  { %v269_v54 = vstv %s402_s5 }
 0x229   :  { %v270_v55 = vmul.f32 %v436_v53, %v269_v54 }
 0x22b   :  { %v271_v59 = vmul.f32 %v594_v10, %v270_v55 }
 0x22d   :  { %v310_v60 = vmul.f32 %v309_v56, %v271_v59  ;;  %v296_v61 = vmul.f32 %v295_v57, %v271_v59 }
 0x22f   :  { %v311_v63 = vsel %vm246_vm3, %v310_v60, 0.0  ;;  %v297_v0 = vsel %vm246_vm3, %v296_v61, 0.0 }
 0x230   :  { %312 = vadd.xlane.f32.xlu0 %v311_v63  ;;  %298 = vadd.xlane.f32.xlu1 %v297_v0 }
 0x234   :  { %342 = vadd.xlane.f32.xlu0 %v341_v1  ;;  %329 = vadd.xlane.f32.xlu1 %v328_v2 }
 0x2bd   :  { %v313_v3 = vpop.xlane.xlu0 %312  ;;  %v299_v4 = vpop.xlane.xlu1 %298 }
 0x2be   :  { %v314_v5 = vrot.slane %v313_v3, 4  ;;  %v300_v10 = vrot.slane %v299_v4, 4 }
 0x2c0   :  { %v315_v6 = vadd.f32 %v314_v5, %v313_v3  ;;  %v301_v7 = vadd.f32 %v300_v10, %v299_v4 }
 0x2c1   :  { %v343_v8 = vpop.xlane.xlu0 %342  ;;  %v330_v9 = vpop.xlane.xlu1 %329 }
 0x2c2   :  { %v316_v11 = vrot.slane %v315_v6, 2  ;;  %v302_v12 = vrot.slane %v301_v7, 2  ;;  %v344_v13 = vrot.slane %v343_v8, 4  ;;  %v331_v14 = vrot.slane %v330_v9, 4 }
 0x2c4   :  { %v345_v15 = vadd.f32 %v344_v13, %v343_v8  ;;  %v332_v16 = vadd.f32 %v331_v14, %v330_v9  ;;  %v303_v17 = vadd.f32 %v302_v12, %v301_v7  ;;  %v317_v18 = vadd.f32 %v316_v11, %v315_v6 }
 0x2c6   :  { %v346_v19 = vrot.slane %v345_v15, 2  ;;  %v333_v20 = vrot.slane %v332_v16, 2  ;;  %v304_v21 = vrot.slane %v303_v17, 1  ;;  %v318_v22 = vrot.slane %v317_v18, 1 }
 0x2c8   :  { %v347_v23 = vadd.f32 %v346_v19, %v345_v15  ;;  %v334_v24 = vadd.f32 %v333_v20, %v332_v16  ;;  %v305_v25 = vadd.f32 %v304_v21, %v303_v17  ;;  %v319_v26 = vadd.f32 %v318_v22, %v317_v18 }
 0x2ca   :  { %403 = vpush %v305_v25  ;;  %v335_v27 = vrot.slane %v334_v24, 1  ;;  %v348_v28 = vrot.slane %v347_v23, 1 }
 0x2cb   :  { %405 = vpush %v319_v26 }
 0x2cc   :  { %v336_v29 = vadd.f32 %v335_v27, %v334_v24  ;;  %v349_v30 = vadd.f32 %v348_v28, %v347_v23 }
 0x2ce   :  { %407 = vpush %v336_v29 }
 0x2cf   :  { %409 = vpush %v349_v30 }
 0x2fb   :  { %s404_s6 = spop %403 }
 0x2fc   :  { %s357_s7 = smul.f32 0.16666667, %s404_s6  ;;  %s406_s9 = spop %405 }
 0x2fd   :  { %s360_s25 = smul.f32 0.16666667, %s406_s9 }
 0x2fe   :  { %359 = sst [smem:[#allocation3 + $0x5]] %s357_s7 }
 0x2ff   :  { %362 = sst [smem:[#allocation3 + $0x6]] %s360_s25  ;;  %s408_s26 = spop %407 }
 0x300   :  { %s351_s0 = smul.f32 0.16666667, %s408_s26  ;;  %s410_s27 = spop %409 }
 0x301   :  { %s354_s28 = smul.f32 0.16666667, %s410_s27 }
 0x302   :  { %353 = sst [smem:[#allocation3 + $0x3]] %s351_s0 }
 0x303   :  { %356 = sst [smem:[#allocation3 + $0x4]] %s354_s28 }
 0x304   :  { %446 = shalt.err (!%p443_p2)
}
 0x305   :  { %s454_s12 = smov [#allocation3]  }
 0x306   :  { %372 = dma.smem_to_hbm %s454_s12, 16, %s676_s11, [#allocation4]  }
 0x307   :  { %447 = dma.done.wait [#allocation4], 16  }
 0x308   :  { %448 = vsyncadd [#allocation4], 4294967280 }
 0x309   :  { %376 = sfence }
 0x30a   :  { %377 = vsyncpa [#allocation4], 1 }

</bundles_post_ra>
